<compile_context>
chip_gen: v7x
topology: tpu7x:2x2x1
jax: 0.10.0
libtpu: 0.0.40
codegen_flags: <defaults>
</compile_context>

<pallas_src>
import functools

import jax
import jax.numpy as jnp
from jax.experimental import pallas as pl
from jax.experimental.pallas import tpu as pltpu


def _round_up(n, m):
    return ((n + m - 1) // m) * m


def _cnn_layer_kernel(x_ref, w_ref, b_ref, o_ref):
    """Single grid step: fused im2col-matmul + bias + ReLU.

    x_ref: (Mp, KCp)  im2col slab, Mp = pad8(B*L_out), KCp = pad128(K*C_in)
    w_ref: (KCp, Fp)  flattened conv weights, Fp = pad128(F)
    b_ref: (1, Fp)    bias row (zero in padded lanes)
    o_ref: (Mp, Fp)   lane-dense output slab
    """
    acc = jnp.dot(x_ref[...], w_ref[...], preferred_element_type=jnp.float32)
    acc = acc + b_ref[...]                              # bias broadcast over rows
    o_ref[...] = jnp.maximum(acc, 0.0).astype(o_ref.dtype)   # ReLU


def prepare_cnn_layer_params(weight, bias):
    """One-time parameter re-layout (hoisted out of the per-call path).

    weight: (F, C_in, K) -- PyTorch Conv1d layout.  bias: (F,).
    Returns (w_mat, b_row): ((pad128(K*C_in), pad128(F)), (1, pad128(F))).
    Row index k*C_in + c of w_mat matches the im2col column order built in
    cnn_layer_forward.
    """
    F_out, C_in, K = weight.shape
    KC = K * C_in
    KCp = _round_up(KC, 128)
    Fp = _round_up(F_out, 128)
    # (F, C_in, K) -> (K, C_in, F) -> (K*C_in, F)
    w_mat = jnp.transpose(weight.astype(jnp.float32), (2, 1, 0)).reshape(KC, F_out)
    w_mat = jnp.pad(w_mat, ((0, KCp - KC), (0, Fp - F_out)))
    b_row = jnp.pad(bias.astype(jnp.float32).reshape(1, F_out),
                    ((0, 0), (0, Fp - F_out)))
    return w_mat, b_row


@functools.partial(jax.jit, static_argnames=("kernel_size", "filters"))
def cnn_layer_forward(x, w_mat, b_row, *, kernel_size, filters):
    """x: (B, L, C_in) f32; w_mat/b_row from prepare_cnn_layer_params.

    Returns (B, L_out, F) with L_out = L - kernel_size + 1 ("valid" conv).
    """
    B, L, C_in = x.shape
    K = kernel_size
    L_out = L - K + 1
    assert L_out > 0, "sequence length must be >= kernel_size"
    KC = K * C_in
    M = B * L_out
    Mp = _round_up(M, 8)
    KCp, Fp = w_mat.shape

    # im2col: x_unf[b*L_out + t, k*C_in + c] = x[b, t + k, c]
    x = x.astype(jnp.float32)
    slabs = [x[:, k:k + L_out, :] for k in range(K)]        # K x (B, L_out, C_in)
    x_unf = jnp.stack(slabs, axis=2).reshape(M, KC)         # (M, K*C_in)
    x_unf = jnp.pad(x_unf, ((0, Mp - M), (0, KCp - KC)))    # lane/sublane pad

    out_padded = pl.pallas_call(
        _cnn_layer_kernel,
        out_shape=jax.ShapeDtypeStruct((Mp, Fp), jnp.float32),
        grid_spec=pltpu.PrefetchScalarGridSpec(
            num_scalar_prefetch=0,
            grid=(1,),                                      # single grid step
            in_specs=[
                pl.BlockSpec((Mp, KCp), lambda i: (0, 0)),
                pl.BlockSpec((KCp, Fp), lambda i: (0, 0)),
                pl.BlockSpec((1, Fp), lambda i: (0, 0)),
            ],
            out_specs=pl.BlockSpec((Mp, Fp), lambda i: (0, 0)),
        ),
        compiler_params=pltpu.CompilerParams(
            dimension_semantics=("arbitrary",)),            # no cross-core split
    )(x_unf, w_mat, b_row)

    # Layout plumbing only: drop lane/sublane padding, restore (B, L_out, F).
    return out_padded[:M, :filters].reshape(B, L_out, filters)


def _reference_forward(x, weight, bias):
    """Pure-JAX reference of the PyTorch forward (eval mode)."""
    B, L, C_in = x.shape
    F_out, _, K = weight.shape
    L_out = L - K + 1
    w_kcf = jnp.transpose(weight, (2, 1, 0))
    out = jnp.zeros((B, L_out, F_out), jnp.float32)
    for k in range(K):
        out = out + jnp.einsum('blc,cf->blf', x[:, k:k + L_out, :], w_kcf[k],
                               precision=jax.lax.Precision.HIGHEST)
    out = out + bias[None, None, :]
    return jnp.maximum(out, 0.0)


if __name__ == "__main__":
    # Module-implied shapes: previous_layer.outputDimensions = C_in = 4,
    # laspeptideSize = 33 = sequence length L, filters = F = 8, kernel_size = 10.
    B, L, C_in, F_out, K = 2, 33, 4, 8, 10

    key = jax.random.PRNGKey(0)
    kx, kw, kb = jax.random.split(key, 3)

    x = jax.random.normal(kx, (B, L, C_in), dtype=jnp.float32)
    # Deterministic synthetic parameters (PyTorch Conv1d weight layout (F, C_in, K)).
    fan_in = C_in * K
    bound = 1.0 / (fan_in ** 0.5)
    weight = jax.random.uniform(kw, (F_out, C_in, K), jnp.float32, -bound, bound)
    bias = jax.random.uniform(kb, (F_out,), jnp.float32, -bound, bound)

    # One-time parameter re-layout (not in the per-call path).
    w_mat, b_row = prepare_cnn_layer_params(weight, bias)

    out = cnn_layer_forward(x, w_mat, b_row, kernel_size=K, filters=F_out)
    out = jax.block_until_ready(out)

    ref = _reference_forward(x, weight, bias)
    assert out.shape == (B, L - K + 1, F_out), out.shape
    # Tolerance allows for MXU f32 pass decomposition vs the HIGHEST-precision
    # reference; any indexing/layout bug would produce O(1) mismatches.
    assert jnp.allclose(out, ref, atol=1e-3, rtol=1e-3), "mismatch vs reference"

    print("KERNEL_OK")
</pallas_src>

<mosaic_0001>
module attributes {stable_mosaic.version = 11 : i64} {
  func.func @_cnn_layer_kernel(%arg0: i32, %arg1: memref<48x128xf32, #tpu.memory_space<vmem>>, %arg2: memref<128x128xf32, #tpu.memory_space<vmem>>, %arg3: memref<1x128xf32, #tpu.memory_space<vmem>>, %arg4: memref<48x128xf32, #tpu.memory_space<vmem>>) attributes {dimension_semantics = [#tpu.dimension_semantics<arbitrary>], iteration_bounds = array<i64: 1>, scalar_prefetch = 0 : i64, scratch_operands = 0 : i64, tpu.core_type = #tpu.core_type<tc>, window_params = [{pipeline_mode = #tpu.pipeline_mode<synchronous>, transform_indices = @transform_0, window_bounds = array<i64: 48, 128>}, {pipeline_mode = #tpu.pipeline_mode<synchronous>, transform_indices = @transform_1, window_bounds = array<i64: 128, 128>}, {pipeline_mode = #tpu.pipeline_mode<synchronous>, transform_indices = @transform_2, window_bounds = array<i64: 1, 128>}, {pipeline_mode = #tpu.pipeline_mode<synchronous>, transform_indices = @transform_3, window_bounds = array<i64: 48, 128>}]} {
    %c0 = arith.constant 0 : index
    %c0_0 = arith.constant 0 : index
    %0 = vector.load %arg1[%c0, %c0_0] : memref<48x128xf32, #tpu.memory_space<vmem>>, vector<48x128xf32>
    %c0_1 = arith.constant 0 : index
    %c0_2 = arith.constant 0 : index
    %1 = vector.load %arg2[%c0_1, %c0_2] : memref<128x128xf32, #tpu.memory_space<vmem>>, vector<128x128xf32>
    %cst = arith.constant dense<0.000000e+00> : vector<48x128xf32>
    %2 = tpu.matmul %0, %1, %cst {dimension_numbers = #tpu.dot_dimension_numbers<[1], [0], [0], [1], [0, 0, 1, 1], [], []>} : vector<48x128xf32>, vector<128x128xf32>, vector<48x128xf32> -> vector<48x128xf32>
    %c0_3 = arith.constant 0 : index
    %c0_4 = arith.constant 0 : index
    %3 = vector.load %arg3[%c0_3, %c0_4] : memref<1x128xf32, #tpu.memory_space<vmem>>, vector<1x128xf32>
    %4 = vector.broadcast %3 : vector<1x128xf32> to vector<48x128xf32>
    %5 = arith.addf %2, %4 : vector<48x128xf32>
    %cst_5 = arith.constant 0.000000e+00 : f32
    %6 = vector.broadcast %cst_5 : f32 to vector<48x128xf32>
    %7 = arith.maximumf %5, %6 : vector<48x128xf32>
    %c0_6 = arith.constant 0 : index
    %c0_7 = arith.constant 0 : index
    %8 = vector.load %arg4[%c0_6, %c0_7] : memref<48x128xf32, #tpu.memory_space<vmem>>, vector<48x128xf32>
    tpu.vector_store %arg4[%c0_6, %c0_7], %7 {strides = array<i32>} : memref<48x128xf32, #tpu.memory_space<vmem>>, vector<48x128xf32>,
    return
  }
  func.func @transform_0(%arg0: i32) -> (i32, i32) {
    %c0_i32 = arith.constant 0 : i32
    %c0_i32_0 = arith.constant 0 : i32
    %c0_i32_1 = arith.constant 0 : i32
    return %c0_i32, %c0_i32_0 : i32, i32
  }
  func.func @transform_1(%arg0: i32) -> (i32, i32) {
    %c0_i32 = arith.constant 0 : i32
    %c0_i32_0 = arith.constant 0 : i32
    %c0_i32_1 = arith.constant 0 : i32
    return %c0_i32, %c0_i32_0 : i32, i32
  }
  func.func @transform_2(%arg0: i32) -> (i32, i32) {
    %c0_i32 = arith.constant 0 : i32
    %c0_i32_0 = arith.constant 0 : i32
    %c0_i32_1 = arith.constant 0 : i32
    return %c0_i32, %c0_i32_0 : i32, i32
  }
  func.func @transform_3(%arg0: i32) -> (i32, i32) {
    %c0_i32 = arith.constant 0 : i32
    %c0_i32_0 = arith.constant 0 : i32
    %c0_i32_1 = arith.constant 0 : i32
    return %c0_i32, %c0_i32_0 : i32, i32
  }
}

</mosaic_0001>

<bundles_post_ra>
// kernel: cnn_layer_forward.1
= control target key start
LH: loop header
LB: loop body
LE: loop exit
PB: predicated region body
PF: predicated region fallthrough
CT: control target
= control target key end

     0   :  { %s373_s1 = inlined_call_operand.vmem [shape: f32[128,128], index: 1, kind: input, shape index: {}]   ;;  %s374_s0 = inlined_call_operand.vmem [shape: f32[48,128], index: 0, kind: input, shape index: {}]   ;;  %s375_s2 = inlined_call_operand.vmem [shape: f32[1,128], index: 2, kind: input, shape index: {}]   ;;  %s376_s3 = inlined_call_operand.vmem [shape: f32[48,128], index: 3, kind: output, shape index: {}]  }
   0x1   :  { %v20_v0 = vld [vmem:[%s373_s1] sm:$0xff]  ;;  %v21_v1 = vld [vmem:[%s373_s1 + $0x8] sm:$0xff]  ;;  %v22_v2 = vld [vmem:[%s373_s1 + $0x10] sm:$0xff] }
   0x2   :  { %v218_v3 = vpack.c.bf16 %v21_v1, %v20_v0  ;;  %v23_v4 = vld [vmem:[%s373_s1 + $0x18] sm:$0xff]  ;;  %v24_v6 = vld [vmem:[%s373_s1 + $0x20] sm:$0xff]  ;;  %v25_v7 = vld [vmem:[%s373_s1 + $0x28] sm:$0xff] }
   0x3   :  { %v222_v5 = vpack.c.bf16 %v23_v4, %v22_v2  ;;  %v226_v8 = vpack.c.bf16 %v25_v7, %v24_v6  ;;  %v16_v9 = vld [vmem:[%s374_s0 + $0x10] sm:$0xff]  ;;  %v27_v11 = vld [vmem:[%s373_s1 + $0x38] sm:$0xff]  ;;  %v14_v12 = vld [vmem:[%s374_s0] sm:$0xff] }
   0x4   :  { %250 = vmatprep.subr.bf16.mxu1 %v218_v3  ;;  %219 = vmatprep.subr.bf16.mxu0 %v218_v3  ;;  %v26_v10 = vld [vmem:[%s373_s1 + $0x30] sm:$0xff]  ;;  %v28_v14 = vld [vmem:[%s373_s1 + $0x40] sm:$0xff]  ;;  %v29_v15 = vld [vmem:[%s373_s1 + $0x48] sm:$0xff] }
   0x5   :  { %258 = vmatpush3.bf16.msra.mxu1 %v218_v3  ;;  %221 = vmatpush3.bf16.msra.mxu0 %v218_v3  ;;  %v230_v13 = vpack.c.bf16 %v27_v11, %v26_v10  ;;  %v234_v16 = vpack.c.bf16 %v29_v15, %v28_v14  ;;  %v30_v17 = vld [vmem:[%s373_s1 + $0x50] sm:$0xff]  ;;  %v31_v18 = vld [vmem:[%s373_s1 + $0x58] sm:$0xff]  ;;  %v32_v20 = vld [vmem:[%s373_s1 + $0x60] sm:$0xff] }
   0x6   :  { %251 = vmatprep.subr.bf16.mxu1 %v222_v5  ;;  %223 = vmatprep.subr.bf16.mxu0 %v222_v5  ;;  %v238_v19 = vpack.c.bf16 %v31_v18, %v30_v17  ;;  %v33_v21 = vld [vmem:[%s373_s1 + $0x68] sm:$0xff]  ;;  %v34_v23 = vld [vmem:[%s373_s1 + $0x70] sm:$0xff]  ;;  %v35_v24 = vld [vmem:[%s373_s1 + $0x78] sm:$0xff] }
   0x7   :  { %212 = vmatprep.mubr.f32.mxu1 %v16_v9  ;;  %209 = vmatprep.mubr.f32.mxu0 %v14_v12  ;;  %v242_v22 = vpack.c.bf16 %v33_v21, %v32_v20  ;;  %v246_v25 = vpack.c.bf16 %v35_v24, %v34_v23  ;;  %v17_v26 = vld [vmem:[%s374_s0 + $0x18] sm:$0xff]  ;;  %v15_v27 = vld [vmem:[%s374_s0 + $0x8] sm:$0xff]  ;;  %v18_v28 = vld [vmem:[%s374_s0 + $0x20] sm:$0xff] }
   0x8   :  { %v19_v29 = vld [vmem:[%s374_s0 + $0x28] sm:$0xff]  ;;  %v154_v30 = vld [vmem:[%s375_s2] ss:$0 sm:$0xff] }
   0x9   :  { %259 = vmatpush3.bf16.msra.mxu1 %v222_v5  ;;  %225 = vmatpush3.bf16.msra.mxu0 %v222_v5 }
   0xa   :  { %252 = vmatprep.subr.bf16.mxu1 %v226_v8  ;;  %227 = vmatprep.subr.bf16.mxu0 %v226_v8 }
   0xd   :  { %260 = vmatpush3.bf16.msra.mxu1 %v226_v8  ;;  %229 = vmatpush3.bf16.msra.mxu0 %v226_v8 }
   0xe   :  { %253 = vmatprep.subr.bf16.mxu1 %v230_v13  ;;  %231 = vmatprep.subr.bf16.mxu0 %v230_v13 }
  0x11   :  { %261 = vmatpush3.bf16.msra.mxu1 %v230_v13  ;;  %233 = vmatpush3.bf16.msra.mxu0 %v230_v13 }
  0x12   :  { %254 = vmatprep.subr.bf16.mxu1 %v234_v16  ;;  %235 = vmatprep.subr.bf16.mxu0 %v234_v16 }
  0x15   :  { %262 = vmatpush3.bf16.msra.mxu1 %v234_v16  ;;  %237 = vmatpush3.bf16.msra.mxu0 %v234_v16 }
  0x16   :  { %255 = vmatprep.subr.bf16.mxu1 %v238_v19  ;;  %239 = vmatprep.subr.bf16.mxu0 %v238_v19 }
  0x19   :  { %263 = vmatpush3.bf16.msra.mxu1 %v238_v19  ;;  %241 = vmatpush3.bf16.msra.mxu0 %v238_v19 }
  0x1a   :  { %256 = vmatprep.subr.bf16.mxu1 %v242_v22  ;;  %243 = vmatprep.subr.bf16.mxu0 %v242_v22 }
  0x1d   :  { %264 = vmatpush3.bf16.msra.mxu1 %v242_v22  ;;  %245 = vmatpush3.bf16.msra.mxu0 %v242_v22 }
  0x1e   :  { %257 = vmatprep.subr.bf16.mxu1 %v246_v25  ;;  %247 = vmatprep.subr.bf16.mxu0 %v246_v25 }
  0x21   :  { %265 = vmatpush3.bf16.msra.mxu1 %v246_v25  ;;  %249 = vmatpush3.bf16.msra.mxu0 %v246_v25 }
  0x24   :  { %213 = vmatmul.mubr.f32.vlgmr.msra.gmra.mrb[0].mxu1 %v17_v26  ;;  %210 = vmatmul.mubr.f32.vlgmr.msra.gmra.mrb[0].mxu0 %v15_v27 }
  0x25   :  { %215 = vmatprep.mubr.f32.mxu1 %v18_v28 }
  0x28   :  { %216 = vmatmul.mubr.f32.gmra.mrb[2].mxu1 %v19_v29 }
  0xf7   :  { %v214_v31 = vpop.f32.mrb[0].mxu1  ;;  %v211_v32 = vpop.f32.mrb[0].mxu0 }
  0xf8   :  { %v125_v33 = vadd.f32 %v214_v31, %v154_v30  ;;  %v119_v34 = vpop.f32.mrb[1].mxu1  ;;  %v115_v35 = vadd.f32 %v211_v32, %v154_v30  ;;  %v109_v36 = vpop.f32.mrb[1].mxu0 }
  0xf9   :  { %v120_v37 = vadd.f32 %v154_v30, %v119_v34  ;;  %v110_v38 = vadd.f32 %v154_v30, %v109_v36 }
  0xfa   :  { %v141_v39 = vmax.f32 %v125_v33, 0.0  ;;  %v139_v40 = vmax.f32 %v115_v35, 0.0 }
  0xfb   :  { %v140_v41 = vmax.f32 %v120_v37, 0.0  ;;  %v138_v42 = vmax.f32 %v110_v38, 0.0  ;;  %v217_v43 = vpop.f32.mrb[2].mxu1 }
  0xfc   :  { %147 = vst [vmem:[%s376_s3 + $0x18] sm:$0xff] %v141_v39  ;;  %145 = vst [vmem:[%s376_s3 + $0x8] sm:$0xff] %v139_v40  ;;  %v135_v44 = vadd.f32 %v217_v43, %v154_v30  ;;  %v129_v45 = vpop.f32.mrb[3].mxu1 }
  0xfd   :  { %146 = vst [vmem:[%s376_s3 + $0x10] sm:$0xff] %v140_v41  ;;  %144 = vst [vmem:[%s376_s3] sm:$0xff] %v138_v42  ;;  %v130_v46 = vadd.f32 %v154_v30, %v129_v45 }
  0xfe   :  { %v143_v47 = vmax.f32 %v135_v44, 0.0 }
  0xff   :  { %v142_v48 = vmax.f32 %v130_v46, 0.0 }
 0x100   :  { %149 = vst [vmem:[%s376_s3 + $0x28] sm:$0xff] %v143_v47 }
 0x101   :  { %148 = vst [vmem:[%s376_s3 + $0x20] sm:$0xff] %v142_v48 }

</bundles_post_ra>
